<compile_context>
chip_gen: v7x
topology: tpu7x:2x2x1
jax: 0.10.0
libtpu: 0.0.40
codegen_flags: <defaults>
</compile_context>

<pallas_src>
import functools
import math

import jax
import jax.numpy as jnp
from jax.experimental import pallas as pl
from jax.experimental.pallas import tpu as pltpu

# ----------------------- model config (small, synthetic) -----------------------
VOCAB = 64
MAX_POS = 16
HIDDEN = 32
NUM_HEADS = 2
HEAD_DIM = HIDDEN // NUM_HEADS
INTERMEDIATE = 64
NUM_LAYERS = 2
NUM_LABELS = 3
LN_EPS = 1e-5

HP = 128          # hidden padded to the 128-lane vreg width (lane-dense HBM slabs)
LABELS_PAD = 128  # classifier output padded to 128 lanes (sliced in the wrapper)

VMEM_SPEC = pl.BlockSpec(memory_space=pltpu.MemorySpace.VMEM)


# --------------------------- in-kernel helpers ----------------------------------
def _ln_padded(x, g, b):
    """LayerNorm over the first HIDDEN lanes of a (M, HP) slab.

    Requires the padded lanes of `x` to be exactly zero; then
      sum(x) over 128 lanes == sum over the HIDDEN real lanes, and
      var = E[x^2] - E[x]^2 is exact without masking.
    gamma/beta are zero in padded lanes, so the output padded lanes stay zero.
    """
    inv_h = 1.0 / HIDDEN
    mean = jnp.sum(x, axis=-1, keepdims=True) * inv_h
    ex2 = jnp.sum(x * x, axis=-1, keepdims=True) * inv_h
    var = ex2 - mean * mean
    y = (x - mean) * jax.lax.rsqrt(var + LN_EPS)
    return y * g + b


# ----------------------------- Pallas kernels ----------------------------------
def _embed_ln_kernel(x_ref, g_ref, b_ref, o_ref):
    o_ref[...] = _ln_padded(x_ref[...], g_ref[...], b_ref[...]).astype(o_ref.dtype)


def _encoder_layer_kernel(x_ref, bias_ref,
                          wqkv_ref, bqkv_ref, wo_ref, bo_ref,
                          ln1_g_ref, ln1_b_ref,
                          w1_ref, b1_ref, w2_ref, b2_ref,
                          ln2_g_ref, ln2_b_ref,
                          o_ref, *, batch, seq):
    """One full transformer encoder layer, fully resident in VMEM.

    x_ref:    (B*S, HP)  f32 hidden slab, padded lanes exactly zero.
    bias_ref: (B, S)     f32 additive attention mask (0 keep / -1e9 pad).
    """
    x = x_ref[...]                                   # (M, HP) f32
    xb = x.astype(jnp.bfloat16)

    # ---- fused QKV projection: one (M,HP)@(HP,3*HIDDEN) MXU matmul ----
    qkv = jnp.dot(xb, wqkv_ref[...], preferred_element_type=jnp.float32)
    qkv = qkv + bqkv_ref[...]                        # (M, 3*HIDDEN) f32

    scale = 1.0 / math.sqrt(HEAD_DIM)
    bias = bias_ref[...]                             # (B, S)
    wo = wo_ref[...]                                 # (HIDDEN, HP) bf16

    # ---- per-head attention (unrolled, NUM_HEADS == 2), f32 softmax ----
    attn = jnp.zeros((batch * seq, HP), jnp.float32)
    for h in range(NUM_HEADS):
        q = qkv[:, h * HEAD_DIM:(h + 1) * HEAD_DIM]
        k = qkv[:, HIDDEN + h * HEAD_DIM:HIDDEN + (h + 1) * HEAD_DIM]
        v = qkv[:, 2 * HIDDEN + h * HEAD_DIM:2 * HIDDEN + (h + 1) * HEAD_DIM]
        q = q.reshape(batch, seq, HEAD_DIM).astype(jnp.bfloat16)
        k = k.reshape(batch, seq, HEAD_DIM).astype(jnp.bfloat16)
        v = v.reshape(batch, seq, HEAD_DIM).astype(jnp.bfloat16)

        s = jnp.einsum("bqd,bkd->bqk", q, k,
                       preferred_element_type=jnp.float32) * scale
        s = s + bias[:, None, :]                     # broadcast mask across heads
        m = jnp.max(s, axis=-1, keepdims=True)
        p = jnp.exp(s - m)
        p = p * pl.reciprocal(jnp.sum(p, axis=-1, keepdims=True), approx=True)

        ctx = jnp.einsum("bqk,bkd->bqd", p.astype(jnp.bfloat16), v,
                         preferred_element_type=jnp.float32)
        ctx = ctx.reshape(batch * seq, HEAD_DIM).astype(jnp.bfloat16)
        # per-head slice of the output projection (sublane slice, 16-aligned)
        attn = attn + jnp.dot(ctx, wo[h * HEAD_DIM:(h + 1) * HEAD_DIM, :],
                              preferred_element_type=jnp.float32)
    attn = attn + bo_ref[...]                        # (M, HP), padded lanes zero

    # ---- residual + LayerNorm 1 (f32) ----
    x1 = _ln_padded(attn + x, ln1_g_ref[...], ln1_b_ref[...])

    # ---- FFN ----
    h1 = jnp.dot(x1.astype(jnp.bfloat16), w1_ref[...],
                 preferred_element_type=jnp.float32) + b1_ref[...]
    # TODO(synk): HF BERT/PhoBERT uses exact erf GELU; tanh approximation used here.
    h1 = jax.nn.gelu(h1, approximate=True)
    ff = jnp.dot(h1.astype(jnp.bfloat16), w2_ref[...],
                 preferred_element_type=jnp.float32) + b2_ref[...]

    # ---- residual + LayerNorm 2 (f32) ----
    x2 = _ln_padded(ff + x1, ln2_g_ref[...], ln2_b_ref[...])
    o_ref[...] = x2.astype(o_ref.dtype)


def _head_kernel(cls_ref, wp_ref, bp_ref, wc_ref, bc_ref, o_ref):
    """Fused pooler (tanh dense over [CLS]) + dropout(identity) + classifier."""
    cls = cls_ref[...].astype(jnp.bfloat16)          # (B, HP)
    pooled = jnp.tanh(jnp.dot(cls, wp_ref[...],
                              preferred_element_type=jnp.float32) + bp_ref[...])
    # Dropout(p=0.2) is identity at inference.
    logits = jnp.dot(pooled.astype(jnp.bfloat16), wc_ref[...],
                     preferred_element_type=jnp.float32) + bc_ref[...]
    o_ref[...] = logits.astype(o_ref.dtype)          # (B, LABELS_PAD) lane-dense


# ------------------------------ pallas wrappers ----------------------------------
def embed_layernorm(x, g, b):
    return pl.pallas_call(
        _embed_ln_kernel,
        out_shape=jax.ShapeDtypeStruct(x.shape, jnp.float32),
        in_specs=[VMEM_SPEC] * 3,
        out_specs=VMEM_SPEC,
    )(x, g, b)


def encoder_layer(lp, x, attn_bias, batch, seq):
    kernel = functools.partial(_encoder_layer_kernel, batch=batch, seq=seq)
    return pl.pallas_call(
        kernel,
        out_shape=jax.ShapeDtypeStruct((batch * seq, HP), jnp.float32),
        in_specs=[VMEM_SPEC] * 14,
        out_specs=VMEM_SPEC,
    )(x, attn_bias,
      lp["wqkv"], lp["bqkv"], lp["wo"], lp["bo"],
      lp["ln1_g"], lp["ln1_b"],
      lp["w1"], lp["b1"], lp["w2"], lp["b2"],
      lp["ln2_g"], lp["ln2_b"])


def pooler_classifier(cls_tok, wp, bp, wc, bc):
    return pl.pallas_call(
        _head_kernel,
        out_shape=jax.ShapeDtypeStruct((cls_tok.shape[0], LABELS_PAD), jnp.float32),
        in_specs=[VMEM_SPEC] * 5,
        out_specs=VMEM_SPEC,
    )(cls_tok, wp, bp, wc, bc)


# ------------------------------- params (padded) ---------------------------------
def init_params(key):
    def dense(k, fan_in, fan_out):
        kw, kb = jax.random.split(k)
        w = jax.random.normal(kw, (fan_in, fan_out), jnp.float32) * 0.02
        b = jax.random.normal(kb, (fan_out,), jnp.float32) * 0.02
        return w, b

    def pad_cols(a, n):
        return jnp.pad(a, ((0, 0), (0, n - a.shape[1])))

    def pad_rows(a, n):
        return jnp.pad(a, ((0, n - a.shape[0]), (0, 0)))

    keys = jax.random.split(key, 8 + NUM_LAYERS)
    p = {
        # embedding tables pre-padded to HP lanes (padded lanes zero)
        "word_emb": pad_cols(jax.random.normal(keys[0], (VOCAB, HIDDEN)) * 0.02, HP),
        "pos_emb": pad_cols(jax.random.normal(keys[1], (MAX_POS, HIDDEN)) * 0.02, HP),
        "type_emb": pad_cols(jax.random.normal(keys[2], (1, HIDDEN)) * 0.02, HP),
        "emb_ln_g": pad_cols(jnp.ones((1, HIDDEN), jnp.float32), HP),
        "emb_ln_b": jnp.zeros((1, HP), jnp.float32),
    }
    wp, bp = dense(keys[3], HIDDEN, HIDDEN)
    p["pooler_w"] = pad_rows(wp, HP).astype(jnp.bfloat16)        # (HP, HIDDEN)
    p["pooler_b"] = bp.reshape(1, HIDDEN)
    wc, bc = dense(keys[4], HIDDEN, NUM_LABELS)
    p["cls_w"] = pad_cols(wc, LABELS_PAD).astype(jnp.bfloat16)   # (HIDDEN, LABELS_PAD)
    p["cls_b"] = pad_cols(bc.reshape(1, NUM_LABELS), LABELS_PAD)

    layers = []
    for li in range(NUM_LAYERS):
        lk = jax.random.split(keys[8 + li], 6)
        wq, bq = dense(lk[0], HIDDEN, HIDDEN)
        wk, bk = dense(lk[1], HIDDEN, HIDDEN)
        wv, bv = dense(lk[2], HIDDEN, HIDDEN)
        wo, bo = dense(lk[3], HIDDEN, HIDDEN)
        w1, b1 = dense(lk[4], HIDDEN, INTERMEDIATE)
        w2, b2 = dense(lk[5], INTERMEDIATE, HIDDEN)
        lp = {
            # fused QKV weight (HP, 3*HIDDEN): [Q | K | V] along the lane axis,
            # padded input rows (32..127) zero so padded input lanes contribute 0.
            "wqkv": pad_rows(jnp.concatenate([wq, wk, wv], axis=1), HP).astype(jnp.bfloat16),
            "bqkv": jnp.concatenate([bq, bk, bv]).reshape(1, 3 * HIDDEN),
            "wo": pad_cols(wo, HP).astype(jnp.bfloat16),          # (HIDDEN, HP)
            "bo": pad_cols(bo.reshape(1, HIDDEN), HP),
            "ln1_g": pad_cols(jnp.ones((1, HIDDEN), jnp.float32), HP),
            "ln1_b": jnp.zeros((1, HP), jnp.float32),
            "w1": pad_rows(w1, HP).astype(jnp.bfloat16),          # (HP, INTERMEDIATE)
            "b1": b1.reshape(1, INTERMEDIATE),
            "w2": pad_cols(w2, HP).astype(jnp.bfloat16),          # (INTERMEDIATE, HP)
            "b2": pad_cols(b2.reshape(1, HIDDEN), HP),
            "ln2_g": pad_cols(jnp.ones((1, HIDDEN), jnp.float32), HP),
            "ln2_b": jnp.zeros((1, HP), jnp.float32),
        }
        layers.append(lp)
    p["layers"] = layers
    return p


# ---------------------------------- forward --------------------------------------
def sentiment_model_forward(params, input_ids, attention_mask):
    """Mirrors SentimentModel.forward (inference: dropout = identity)."""
    B, S = input_ids.shape

    # XLA glue: embedding gather + adds (tables are pre-padded to HP lanes).
    x = (params["word_emb"][input_ids]
         + params["pos_emb"][None, :S, :]
         + params["type_emb"][None, :, :])                       # (B, S, HP)
    x = embed_layernorm(x.reshape(B * S, HP),
                        params["emb_ln_g"], params["emb_ln_b"])  # (B*S, HP)

    # Additive attention mask bias computed once per forward (0 keep / -1e9 pad).
    attn_bias = (1.0 - attention_mask.astype(jnp.float32)) * (-1e9)   # (B, S)

    for lp in params["layers"]:
        x = encoder_layer(lp, x, attn_bias, B, S)

    # Pooler + classifier head on the [CLS] token (one fused kernel).
    cls_tok = x.reshape(B, S, HP)[:, 0, :]                       # (B, HP)
    logits_pad = pooler_classifier(cls_tok,
                                   params["pooler_w"], params["pooler_b"],
                                   params["cls_w"], params["cls_b"])
    return logits_pad[:, :NUM_LABELS]


if __name__ == "__main__":
    key = jax.random.PRNGKey(0)
    k_params, k_ids = jax.random.split(key)

    params = init_params(k_params)

    B, S = 2, 8
    input_ids = jax.random.randint(k_ids, (B, S), 0, VOCAB, dtype=jnp.int32)
    attention_mask = jnp.ones((B, S), dtype=jnp.int32)
    attention_mask = attention_mask.at[1, 6:].set(0)  # pad tail of 2nd example

    fwd = jax.jit(sentiment_model_forward)
    logits = fwd(params, input_ids, attention_mask)
    jax.block_until_ready(logits)
    assert logits.shape == (B, NUM_LABELS)
    assert bool(jnp.all(jnp.isfinite(logits)))
    print("KERNEL_OK")
</pallas_src>

<mosaic_0001>
module attributes {stable_mosaic.version = 11 : i64} {
  func.func @_embed_ln_kernel(%arg0: memref<16x128xf32, #tpu.memory_space<vmem>>, %arg1: memref<1x128xf32, #tpu.memory_space<vmem>>, %arg2: memref<1x128xf32, #tpu.memory_space<vmem>>, %arg3: memref<16x128xf32, #tpu.memory_space<vmem>>) attributes {dimension_semantics = [], scalar_prefetch = 0 : i64, scratch_operands = 0 : i64, tpu.core_type = #tpu.core_type<tc>} {
    %c0 = arith.constant 0 : index
    %c0_0 = arith.constant 0 : index
    %0 = vector.load %arg0[%c0, %c0_0] : memref<16x128xf32, #tpu.memory_space<vmem>>, vector<16x128xf32>
    %c0_1 = arith.constant 0 : index
    %c0_2 = arith.constant 0 : index
    %1 = vector.load %arg1[%c0_1, %c0_2] : memref<1x128xf32, #tpu.memory_space<vmem>>, vector<1x128xf32>
    %c0_3 = arith.constant 0 : index
    %c0_4 = arith.constant 0 : index
    %2 = vector.load %arg2[%c0_3, %c0_4] : memref<1x128xf32, #tpu.memory_space<vmem>>, vector<1x128xf32>
    %cst = arith.constant dense<0.000000e+00> : vector<16xf32>
    %3 = vector.multi_reduction <add>, %0, %cst [1] : vector<16x128xf32> to vector<16xf32>
    %4 = vector.shape_cast %3 : vector<16xf32> to vector<16x1xf32>
    %cst_5 = arith.constant 3.125000e-02 : f32
    %5 = vector.broadcast %cst_5 : f32 to vector<16x1xf32>
    %6 = arith.mulf %4, %5 : vector<16x1xf32>
    %7 = arith.mulf %0, %0 : vector<16x128xf32>
    %cst_6 = arith.constant dense<0.000000e+00> : vector<16xf32>
    %8 = vector.multi_reduction <add>, %7, %cst_6 [1] : vector<16x128xf32> to vector<16xf32>
    %9 = vector.shape_cast %8 : vector<16xf32> to vector<16x1xf32>
    %cst_7 = arith.constant 3.125000e-02 : f32
    %10 = vector.broadcast %cst_7 : f32 to vector<16x1xf32>
    %11 = arith.mulf %9, %10 : vector<16x1xf32>
    %12 = arith.mulf %6, %6 : vector<16x1xf32>
    %13 = arith.subf %11, %12 : vector<16x1xf32>
    %14 = vector.broadcast %6 : vector<16x1xf32> to vector<16x128xf32>
    %15 = arith.subf %0, %14 : vector<16x128xf32>
    %cst_8 = arith.constant 9.99999974E-6 : f32
    %16 = vector.broadcast %cst_8 : f32 to vector<16x1xf32>
    %17 = arith.addf %13, %16 : vector<16x1xf32>
    %18 = math.rsqrt %17 : vector<16x1xf32>
    %19 = vector.broadcast %18 : vector<16x1xf32> to vector<16x128xf32>
    %20 = arith.mulf %15, %19 : vector<16x128xf32>
    %21 = vector.broadcast %1 : vector<1x128xf32> to vector<16x128xf32>
    %22 = arith.mulf %20, %21 : vector<16x128xf32>
    %23 = vector.broadcast %2 : vector<1x128xf32> to vector<16x128xf32>
    %24 = arith.addf %22, %23 : vector<16x128xf32>
    %c0_9 = arith.constant 0 : index
    %c0_10 = arith.constant 0 : index
    %25 = vector.load %arg3[%c0_9, %c0_10] : memref<16x128xf32, #tpu.memory_space<vmem>>, vector<16x128xf32>
    tpu.vector_store %arg3[%c0_9, %c0_10], %24 {strides = array<i32>} : memref<16x128xf32, #tpu.memory_space<vmem>>, vector<16x128xf32>,
    return
  }
}

module attributes {stable_mosaic.version = 11 : i64} {
  func.func @_encoder_layer_kernel(%arg0: memref<16x128xf32, #tpu.memory_space<vmem>>, %arg1: memref<2x8xf32, #tpu.memory_space<vmem>>, %arg2: memref<128x96xbf16, #tpu.memory_space<vmem>>, %arg3: memref<1x96xf32, #tpu.memory_space<vmem>>, %arg4: memref<32x128xbf16, #tpu.memory_space<vmem>>, %arg5: memref<1x128xf32, #tpu.memory_space<vmem>>, %arg6: memref<1x128xf32, #tpu.memory_space<vmem>>, %arg7: memref<1x128xf32, #tpu.memory_space<vmem>>, %arg8: memref<128x64xbf16, #tpu.memory_space<vmem>>, %arg9: memref<1x64xf32, #tpu.memory_space<vmem>>, %arg10: memref<64x128xbf16, #tpu.memory_space<vmem>>, %arg11: memref<1x128xf32, #tpu.memory_space<vmem>>, %arg12: memref<1x128xf32, #tpu.memory_space<vmem>>, %arg13: memref<1x128xf32, #tpu.memory_space<vmem>>, %arg14: memref<16x128xf32, #tpu.memory_space<vmem>>) attributes {dimension_semantics = [], scalar_prefetch = 0 : i64, scratch_operands = 0 : i64, tpu.core_type = #tpu.core_type<tc>} {
    %c0 = arith.constant 0 : index
    %c0_0 = arith.constant 0 : index
    %0 = vector.load %arg0[%c0, %c0_0] : memref<16x128xf32, #tpu.memory_space<vmem>>, vector<16x128xf32>
    %1 = arith.truncf %0 : vector<16x128xf32> to vector<16x128xbf16>
    %c0_1 = arith.constant 0 : index
    %c0_2 = arith.constant 0 : index
    %2 = vector.load %arg2[%c0_1, %c0_2] : memref<128x96xbf16, #tpu.memory_space<vmem>>, vector<128x96xbf16>
    %cst = arith.constant dense<0.000000e+00> : vector<16x96xf32>
    %3 = tpu.matmul %1, %2, %cst {dimension_numbers = #tpu.dot_dimension_numbers<[1], [0], [0], [1], [0, 0, 1, 1], [], []>} : vector<16x128xbf16>, vector<128x96xbf16>, vector<16x96xf32> -> vector<16x96xf32>
    %c0_3 = arith.constant 0 : index
    %c0_4 = arith.constant 0 : index
    %4 = vector.load %arg3[%c0_3, %c0_4] : memref<1x96xf32, #tpu.memory_space<vmem>>, vector<1x96xf32>
    %5 = vector.broadcast %4 : vector<1x96xf32> to vector<16x96xf32>
    %6 = arith.addf %3, %5 : vector<16x96xf32>
    %c0_5 = arith.constant 0 : index
    %c0_6 = arith.constant 0 : index
    %7 = vector.load %arg1[%c0_5, %c0_6] : memref<2x8xf32, #tpu.memory_space<vmem>>, vector<2x8xf32>
    %c0_7 = arith.constant 0 : index
    %c0_8 = arith.constant 0 : index
    %8 = vector.load %arg4[%c0_7, %c0_8] : memref<32x128xbf16, #tpu.memory_space<vmem>>, vector<32x128xbf16>
    %cst_9 = arith.constant 0.000000e+00 : f32
    %9 = vector.broadcast %cst_9 : f32 to vector<16x128xf32>
    %10 = vector.extract_strided_slice %6 {offsets = [0, 0], sizes = [16, 16], strides = [1, 1]} : vector<16x96xf32> to vector<16x16xf32>
    %11 = vector.extract_strided_slice %6 {offsets = [0, 32], sizes = [16, 16], strides = [1, 1]} : vector<16x96xf32> to vector<16x16xf32>
    %12 = vector.extract_strided_slice %6 {offsets = [0, 64], sizes = [16, 16], strides = [1, 1]} : vector<16x96xf32> to vector<16x16xf32>
    %13 = vector.shape_cast %10 : vector<16x16xf32> to vector<2x8x16xf32>
    %14 = arith.truncf %13 : vector<2x8x16xf32> to vector<2x8x16xbf16>
    %15 = vector.shape_cast %11 : vector<16x16xf32> to vector<2x8x16xf32>
    %16 = arith.truncf %15 : vector<2x8x16xf32> to vector<2x8x16xbf16>
    %17 = vector.shape_cast %12 : vector<16x16xf32> to vector<2x8x16xf32>
    %18 = arith.truncf %17 : vector<2x8x16xf32> to vector<2x8x16xbf16>
    "tpu.trace_start"() <{level = 10 : i32, message = "bqd,bkd->bqk"}> : () -> ()
    %cst_10 = arith.constant dense<0.000000e+00> : vector<2x8x8xf32>
    %19 = tpu.matmul %14, %16, %cst_10 {dimension_numbers = #tpu.dot_dimension_numbers<[2], [2], [1], [1], [0, 0, 0, 1, 1, 1], [0], [0]>} : vector<2x8x16xbf16>, vector<2x8x16xbf16>, vector<2x8x8xf32> -> vector<2x8x8xf32>
    "tpu.trace_stop"() : () -> ()
    %cst_11 = arith.constant 2.500000e-01 : f32
    %20 = vector.broadcast %cst_11 : f32 to vector<2x8x8xf32>
    %21 = arith.mulf %19, %20 : vector<2x8x8xf32>
    %22 = vector.shape_cast %7 : vector<2x8xf32> to vector<2x1x8xf32>
    %23 = vector.broadcast %22 : vector<2x1x8xf32> to vector<2x8x8xf32>
    %24 = arith.addf %21, %23 : vector<2x8x8xf32>
    %cst_12 = arith.constant dense<0xFF800000> : vector<2x8xf32>
    %25 = vector.multi_reduction <maximumf>, %24, %cst_12 [2] : vector<2x8x8xf32> to vector<2x8xf32>
    %26 = vector.shape_cast %25 : vector<2x8xf32> to vector<2x8x1xf32>
    %27 = vector.broadcast %26 : vector<2x8x1xf32> to vector<2x8x8xf32>
    %28 = arith.subf %24, %27 : vector<2x8x8xf32>
    %29 = math.exp %28 : vector<2x8x8xf32>
    %cst_13 = arith.constant dense<0.000000e+00> : vector<2x8xf32>
    %30 = vector.multi_reduction <add>, %29, %cst_13 [2] : vector<2x8x8xf32> to vector<2x8xf32>
    %31 = vector.shape_cast %30 : vector<2x8xf32> to vector<2x8x1xf32>
    %32 = tpu.reciprocal %31 {approx = true} : vector<2x8x1xf32> -> vector<2x8x1xf32>
    %33 = vector.broadcast %32 : vector<2x8x1xf32> to vector<2x8x8xf32>
    %34 = arith.mulf %29, %33 : vector<2x8x8xf32>
    %35 = arith.truncf %34 : vector<2x8x8xf32> to vector<2x8x8xbf16>
    "tpu.trace_start"() <{level = 10 : i32, message = "bqk,bkd->bqd"}> : () -> ()
    %cst_14 = arith.constant dense<0.000000e+00> : vector<2x8x16xf32>
    %36 = tpu.matmul %35, %18, %cst_14 {dimension_numbers = #tpu.dot_dimension_numbers<[2], [1], [1], [2], [0, 0, 0, 1, 1, 2], [0], [0]>} : vector<2x8x8xbf16>, vector<2x8x16xbf16>, vector<2x8x16xf32> -> vector<2x8x16xf32>
    "tpu.trace_stop"() : () -> ()
    %37 = vector.shape_cast %36 : vector<2x8x16xf32> to vector<16x16xf32>
    %38 = arith.truncf %37 : vector<16x16xf32> to vector<16x16xbf16>
    %39 = vector.extract_strided_slice %8 {offsets = [0, 0], sizes = [16, 128], strides = [1, 1]} : vector<32x128xbf16> to vector<16x128xbf16>
    %cst_15 = arith.constant dense<0.000000e+00> : vector<16x128xf32>
    %40 = tpu.matmul %38, %39, %cst_15 {dimension_numbers = #tpu.dot_dimension_numbers<[1], [0], [0], [1], [0, 0, 1, 1], [], []>} : vector<16x16xbf16>, vector<16x128xbf16>, vector<16x128xf32> -> vector<16x128xf32>
    %41 = arith.addf %9, %40 : vector<16x128xf32>
    %42 = vector.extract_strided_slice %6 {offsets = [0, 16], sizes = [16, 16], strides = [1, 1]} : vector<16x96xf32> to vector<16x16xf32>
    %43 = vector.extract_strided_slice %6 {offsets = [0, 48], sizes = [16, 16], strides = [1, 1]} : vector<16x96xf32> to vector<16x16xf32>
    %44 = vector.extract_strided_slice %6 {offsets = [0, 80], sizes = [16, 16], strides = [1, 1]} : vector<16x96xf32> to vector<16x16xf32>
    %45 = vector.shape_cast %42 : vector<16x16xf32> to vector<2x8x16xf32>
    %46 = arith.truncf %45 : vector<2x8x16xf32> to vector<2x8x16xbf16>
    %47 = vector.shape_cast %43 : vector<16x16xf32> to vector<2x8x16xf32>
    %48 = arith.truncf %47 : vector<2x8x16xf32> to vector<2x8x16xbf16>
    %49 = vector.shape_cast %44 : vector<16x16xf32> to vector<2x8x16xf32>
    %50 = arith.truncf %49 : vector<2x8x16xf32> to vector<2x8x16xbf16>
    "tpu.trace_start"() <{level = 10 : i32, message = "bqd,bkd->bqk"}> : () -> ()
    %cst_16 = arith.constant dense<0.000000e+00> : vector<2x8x8xf32>
    %51 = tpu.matmul %46, %48, %cst_16 {dimension_numbers = #tpu.dot_dimension_numbers<[2], [2], [1], [1], [0, 0, 0, 1, 1, 1], [0], [0]>} : vector<2x8x16xbf16>, vector<2x8x16xbf16>, vector<2x8x8xf32> -> vector<2x8x8xf32>
    "tpu.trace_stop"() : () -> ()
    %cst_17 = arith.constant 2.500000e-01 : f32
    %52 = vector.broadcast %cst_17 : f32 to vector<2x8x8xf32>
    %53 = arith.mulf %51, %52 : vector<2x8x8xf32>
    %54 = vector.shape_cast %7 : vector<2x8xf32> to vector<2x1x8xf32>
    %55 = vector.broadcast %54 : vector<2x1x8xf32> to vector<2x8x8xf32>
    %56 = arith.addf %53, %55 : vector<2x8x8xf32>
    %cst_18 = arith.constant dense<0xFF800000> : vector<2x8xf32>
    %57 = vector.multi_reduction <maximumf>, %56, %cst_18 [2] : vector<2x8x8xf32> to vector<2x8xf32>
    %58 = vector.shape_cast %57 : vector<2x8xf32> to vector<2x8x1xf32>
    %59 = vector.broadcast %58 : vector<2x8x1xf32> to vector<2x8x8xf32>
    %60 = arith.subf %56, %59 : vector<2x8x8xf32>
    %61 = math.exp %60 : vector<2x8x8xf32>
    %cst_19 = arith.constant dense<0.000000e+00> : vector<2x8xf32>
    %62 = vector.multi_reduction <add>, %61, %cst_19 [2] : vector<2x8x8xf32> to vector<2x8xf32>
    %63 = vector.shape_cast %62 : vector<2x8xf32> to vector<2x8x1xf32>
    %64 = tpu.reciprocal %63 {approx = true} : vector<2x8x1xf32> -> vector<2x8x1xf32>
    %65 = vector.broadcast %64 : vector<2x8x1xf32> to vector<2x8x8xf32>
    %66 = arith.mulf %61, %65 : vector<2x8x8xf32>
    %67 = arith.truncf %66 : vector<2x8x8xf32> to vector<2x8x8xbf16>
    "tpu.trace_start"() <{level = 10 : i32, message = "bqk,bkd->bqd"}> : () -> ()
    %cst_20 = arith.constant dense<0.000000e+00> : vector<2x8x16xf32>
    %68 = tpu.matmul %67, %50, %cst_20 {dimension_numbers = #tpu.dot_dimension_numbers<[2], [1], [1], [2], [0, 0, 0, 1, 1, 2], [0], [0]>} : vector<2x8x8xbf16>, vector<2x8x16xbf16>, vector<2x8x16xf32> -> vector<2x8x16xf32>
    "tpu.trace_stop"() : () -> ()
    %69 = vector.shape_cast %68 : vector<2x8x16xf32> to vector<16x16xf32>
    %70 = arith.truncf %69 : vector<16x16xf32> to vector<16x16xbf16>
    %71 = vector.extract_strided_slice %8 {offsets = [16, 0], sizes = [16, 128], strides = [1, 1]} : vector<32x128xbf16> to vector<16x128xbf16>
    %cst_21 = arith.constant dense<0.000000e+00> : vector<16x128xf32>
    %72 = tpu.matmul %70, %71, %cst_21 {dimension_numbers = #tpu.dot_dimension_numbers<[1], [0], [0], [1], [0, 0, 1, 1], [], []>} : vector<16x16xbf16>, vector<16x128xbf16>, vector<16x128xf32> -> vector<16x128xf32>
    %73 = arith.addf %41, %72 : vector<16x128xf32>
    %c0_22 = arith.constant 0 : index
    %c0_23 = arith.constant 0 : index
    %74 = vector.load %arg5[%c0_22, %c0_23] : memref<1x128xf32, #tpu.memory_space<vmem>>, vector<1x128xf32>
    %75 = vector.broadcast %74 : vector<1x128xf32> to vector<16x128xf32>
    %76 = arith.addf %73, %75 : vector<16x128xf32>
    %77 = arith.addf %76, %0 : vector<16x128xf32>
    %c0_24 = arith.constant 0 : index
    %c0_25 = arith.constant 0 : index
    %78 = vector.load %arg6[%c0_24, %c0_25] : memref<1x128xf32, #tpu.memory_space<vmem>>, vector<1x128xf32>
    %c0_26 = arith.constant 0 : index
    %c0_27 = arith.constant 0 : index
    %79 = vector.load %arg7[%c0_26, %c0_27] : memref<1x128xf32, #tpu.memory_space<vmem>>, vector<1x128xf32>
    %cst_28 = arith.constant dense<0.000000e+00> : vector<16xf32>
    %80 = vector.multi_reduction <add>, %77, %cst_28 [1] : vector<16x128xf32> to vector<16xf32>
    %81 = vector.shape_cast %80 : vector<16xf32> to vector<16x1xf32>
    %cst_29 = arith.constant 3.125000e-02 : f32
    %82 = vector.broadcast %cst_29 : f32 to vector<16x1xf32>
    %83 = arith.mulf %81, %82 : vector<16x1xf32>
    %84 = arith.mulf %77, %77 : vector<16x128xf32>
    %cst_30 = arith.constant dense<0.000000e+00> : vector<16xf32>
    %85 = vector.multi_reduction <add>, %84, %cst_30 [1] : vector<16x128xf32> to vector<16xf32>
    %86 = vector.shape_cast %85 : vector<16xf32> to vector<16x1xf32>
    %cst_31 = arith.constant 3.125000e-02 : f32
    %87 = vector.broadcast %cst_31 : f32 to vector<16x1xf32>
    %88 = arith.mulf %86, %87 : vector<16x1xf32>
    %89 = arith.mulf %83, %83 : vector<16x1xf32>
    %90 = arith.subf %88, %89 : vector<16x1xf32>
    %91 = vector.broadcast %83 : vector<16x1xf32> to vector<16x128xf32>
    %92 = arith.subf %77, %91 : vector<16x128xf32>
    %cst_32 = arith.constant 9.99999974E-6 : f32
    %93 = vector.broadcast %cst_32 : f32 to vector<16x1xf32>
    %94 = arith.addf %90, %93 : vector<16x1xf32>
    %95 = math.rsqrt %94 : vector<16x1xf32>
    %96 = vector.broadcast %95 : vector<16x1xf32> to vector<16x128xf32>
    %97 = arith.mulf %92, %96 : vector<16x128xf32>
    %98 = vector.broadcast %78 : vector<1x128xf32> to vector<16x128xf32>
    %99 = arith.mulf %97, %98 : vector<16x128xf32>
    %100 = vector.broadcast %79 : vector<1x128xf32> to vector<16x128xf32>
    %101 = arith.addf %99, %100 : vector<16x128xf32>
    %102 = arith.truncf %101 : vector<16x128xf32> to vector<16x128xbf16>
    %c0_33 = arith.constant 0 : index
    %c0_34 = arith.constant 0 : index
    %103 = vector.load %arg8[%c0_33, %c0_34] : memref<128x64xbf16, #tpu.memory_space<vmem>>, vector<128x64xbf16>
    %cst_35 = arith.constant dense<0.000000e+00> : vector<16x64xf32>
    %104 = tpu.matmul %102, %103, %cst_35 {dimension_numbers = #tpu.dot_dimension_numbers<[1], [0], [0], [1], [0, 0, 1, 1], [], []>} : vector<16x128xbf16>, vector<128x64xbf16>, vector<16x64xf32> -> vector<16x64xf32>
    %c0_36 = arith.constant 0 : index
    %c0_37 = arith.constant 0 : index
    %105 = vector.load %arg9[%c0_36, %c0_37] : memref<1x64xf32, #tpu.memory_space<vmem>>, vector<1x64xf32>
    %106 = vector.broadcast %105 : vector<1x64xf32> to vector<16x64xf32>
    %107 = arith.addf %104, %106 : vector<16x64xf32>
    %108 = arith.mulf %107, %107 : vector<16x64xf32>
    %109 = arith.mulf %107, %108 : vector<16x64xf32>
    %cst_38 = arith.constant 4.471500e-02 : f32
    %110 = vector.broadcast %cst_38 : f32 to vector<16x64xf32>
    %111 = arith.mulf %110, %109 : vector<16x64xf32>
    %112 = arith.addf %107, %111 : vector<16x64xf32>
    %cst_39 = arith.constant 0.797884583 : f32
    %113 = vector.broadcast %cst_39 : f32 to vector<16x64xf32>
    %114 = arith.mulf %113, %112 : vector<16x64xf32>
    %115 = math.tanh %114 : vector<16x64xf32>
    %cst_40 = arith.constant 1.000000e+00 : f32
    %116 = vector.broadcast %cst_40 : f32 to vector<16x64xf32>
    %117 = arith.addf %116, %115 : vector<16x64xf32>
    %cst_41 = arith.constant 5.000000e-01 : f32
    %118 = vector.broadcast %cst_41 : f32 to vector<16x64xf32>
    %119 = arith.mulf %118, %117 : vector<16x64xf32>
    %120 = arith.mulf %107, %119 : vector<16x64xf32>
    %121 = arith.truncf %120 : vector<16x64xf32> to vector<16x64xbf16>
    %c0_42 = arith.constant 0 : index
    %c0_43 = arith.constant 0 : index
    %122 = vector.load %arg10[%c0_42, %c0_43] : memref<64x128xbf16, #tpu.memory_space<vmem>>, vector<64x128xbf16>
    %cst_44 = arith.constant dense<0.000000e+00> : vector<16x128xf32>
    %123 = tpu.matmul %121, %122, %cst_44 {dimension_numbers = #tpu.dot_dimension_numbers<[1], [0], [0], [1], [0, 0, 1, 1], [], []>} : vector<16x64xbf16>, vector<64x128xbf16>, vector<16x128xf32> -> vector<16x128xf32>
    %c0_45 = arith.constant 0 : index
    %c0_46 = arith.constant 0 : index
    %124 = vector.load %arg11[%c0_45, %c0_46] : memref<1x128xf32, #tpu.memory_space<vmem>>, vector<1x128xf32>
    %125 = vector.broadcast %124 : vector<1x128xf32> to vector<16x128xf32>
    %126 = arith.addf %123, %125 : vector<16x128xf32>
    %127 = arith.addf %126, %101 : vector<16x128xf32>
    %c0_47 = arith.constant 0 : index
    %c0_48 = arith.constant 0 : index
    %128 = vector.load %arg12[%c0_47, %c0_48] : memref<1x128xf32, #tpu.memory_space<vmem>>, vector<1x128xf32>
    %c0_49 = arith.constant 0 : index
    %c0_50 = arith.constant 0 : index
    %129 = vector.load %arg13[%c0_49, %c0_50] : memref<1x128xf32, #tpu.memory_space<vmem>>, vector<1x128xf32>
    %cst_51 = arith.constant dense<0.000000e+00> : vector<16xf32>
    %130 = vector.multi_reduction <add>, %127, %cst_51 [1] : vector<16x128xf32> to vector<16xf32>
    %131 = vector.shape_cast %130 : vector<16xf32> to vector<16x1xf32>
    %cst_52 = arith.constant 3.125000e-02 : f32
    %132 = vector.broadcast %cst_52 : f32 to vector<16x1xf32>
    %133 = arith.mulf %131, %132 : vector<16x1xf32>
    %134 = arith.mulf %127, %127 : vector<16x128xf32>
    %cst_53 = arith.constant dense<0.000000e+00> : vector<16xf32>
    %135 = vector.multi_reduction <add>, %134, %cst_53 [1] : vector<16x128xf32> to vector<16xf32>
    %136 = vector.shape_cast %135 : vector<16xf32> to vector<16x1xf32>
    %cst_54 = arith.constant 3.125000e-02 : f32
    %137 = vector.broadcast %cst_54 : f32 to vector<16x1xf32>
    %138 = arith.mulf %136, %137 : vector<16x1xf32>
    %139 = arith.mulf %133, %133 : vector<16x1xf32>
    %140 = arith.subf %138, %139 : vector<16x1xf32>
    %141 = vector.broadcast %133 : vector<16x1xf32> to vector<16x128xf32>
    %142 = arith.subf %127, %141 : vector<16x128xf32>
    %cst_55 = arith.constant 9.99999974E-6 : f32
    %143 = vector.broadcast %cst_55 : f32 to vector<16x1xf32>
    %144 = arith.addf %140, %143 : vector<16x1xf32>
    %145 = math.rsqrt %144 : vector<16x1xf32>
    %146 = vector.broadcast %145 : vector<16x1xf32> to vector<16x128xf32>
    %147 = arith.mulf %142, %146 : vector<16x128xf32>
    %148 = vector.broadcast %128 : vector<1x128xf32> to vector<16x128xf32>
    %149 = arith.mulf %147, %148 : vector<16x128xf32>
    %150 = vector.broadcast %129 : vector<1x128xf32> to vector<16x128xf32>
    %151 = arith.addf %149, %150 : vector<16x128xf32>
    %c0_56 = arith.constant 0 : index
    %c0_57 = arith.constant 0 : index
    %152 = vector.load %arg14[%c0_56, %c0_57] : memref<16x128xf32, #tpu.memory_space<vmem>>, vector<16x128xf32>
    tpu.vector_store %arg14[%c0_56, %c0_57], %151 {strides = array<i32>} : memref<16x128xf32, #tpu.memory_space<vmem>>, vector<16x128xf32>,
    return
  }
}

module attributes {stable_mosaic.version = 11 : i64} {
  func.func @_head_kernel(%arg0: memref<2x128xf32, #tpu.memory_space<vmem>>, %arg1: memref<128x32xbf16, #tpu.memory_space<vmem>>, %arg2: memref<1x32xf32, #tpu.memory_space<vmem>>, %arg3: memref<32x128xbf16, #tpu.memory_space<vmem>>, %arg4: memref<1x128xf32, #tpu.memory_space<vmem>>, %arg5: memref<2x128xf32, #tpu.memory_space<vmem>>) attributes {dimension_semantics = [], scalar_prefetch = 0 : i64, scratch_operands = 0 : i64, tpu.core_type = #tpu.core_type<tc>} {
    %c0 = arith.constant 0 : index
    %c0_0 = arith.constant 0 : index
    %0 = vector.load %arg0[%c0, %c0_0] : memref<2x128xf32, #tpu.memory_space<vmem>>, vector<2x128xf32>
    %1 = arith.truncf %0 : vector<2x128xf32> to vector<2x128xbf16>
    %c0_1 = arith.constant 0 : index
    %c0_2 = arith.constant 0 : index
    %2 = vector.load %arg1[%c0_1, %c0_2] : memref<128x32xbf16, #tpu.memory_space<vmem>>, vector<128x32xbf16>
    %cst = arith.constant dense<0.000000e+00> : vector<2x32xf32>
    %3 = tpu.matmul %1, %2, %cst {dimension_numbers = #tpu.dot_dimension_numbers<[1], [0], [0], [1], [0, 0, 1, 1], [], []>} : vector<2x128xbf16>, vector<128x32xbf16>, vector<2x32xf32> -> vector<2x32xf32>
    %c0_3 = arith.constant 0 : index
    %c0_4 = arith.constant 0 : index
    %4 = vector.load %arg2[%c0_3, %c0_4] : memref<1x32xf32, #tpu.memory_space<vmem>>, vector<1x32xf32>
    %5 = vector.broadcast %4 : vector<1x32xf32> to vector<2x32xf32>
    %6 = arith.addf %3, %5 : vector<2x32xf32>
    %7 = math.tanh %6 : vector<2x32xf32>
    %8 = arith.truncf %7 : vector<2x32xf32> to vector<2x32xbf16>
    %c0_5 = arith.constant 0 : index
    %c0_6 = arith.constant 0 : index
    %9 = vector.load %arg3[%c0_5, %c0_6] : memref<32x128xbf16, #tpu.memory_space<vmem>>, vector<32x128xbf16>
    %cst_7 = arith.constant dense<0.000000e+00> : vector<2x128xf32>
    %10 = tpu.matmul %8, %9, %cst_7 {dimension_numbers = #tpu.dot_dimension_numbers<[1], [0], [0], [1], [0, 0, 1, 1], [], []>} : vector<2x32xbf16>, vector<32x128xbf16>, vector<2x128xf32> -> vector<2x128xf32>
    %c0_8 = arith.constant 0 : index
    %c0_9 = arith.constant 0 : index
    %11 = vector.load %arg4[%c0_8, %c0_9] : memref<1x128xf32, #tpu.memory_space<vmem>>, vector<1x128xf32>
    %12 = vector.broadcast %11 : vector<1x128xf32> to vector<2x128xf32>
    %13 = arith.addf %10, %12 : vector<2x128xf32>
    %c0_10 = arith.constant 0 : index
    %c0_11 = arith.constant 0 : index
    %14 = vector.load %arg5[%c0_10, %c0_11] : memref<2x128xf32, #tpu.memory_space<vmem>>, vector<2x128xf32>
    tpu.vector_store %arg5[%c0_10, %c0_11], %13 {strides = array<i32>} : memref<2x128xf32, #tpu.memory_space<vmem>>, vector<2x128xf32>,
    return
  }
}

</mosaic_0001>

<bundles_post_ra>
// kernel: sentiment_model_forward.4
= control target key start
LH: loop header
LB: loop body
LE: loop exit
PB: predicated region body
PF: predicated region fallthrough
CT: control target
= control target key end

     0   :  { %s110_s0 = inlined_call_operand.vmem [shape: f32[16,128], index: 0, kind: input, shape index: {}]   ;;  %s111_s1 = inlined_call_operand.vmem [shape: f32[1,128], index: 1, kind: input, shape index: {}]   ;;  %s112_s2 = inlined_call_operand.vmem [shape: f32[1,128], index: 2, kind: input, shape index: {}]   ;;  %s113_s3 = inlined_call_operand.vmem [shape: f32[16,128], index: 3, kind: output, shape index: {}]  }
   0x1   :  { %v14_v0 = vld [vmem:[%s110_s0] sm:$0xff]  ;;  %v15_v1 = vld [vmem:[%s110_s0 + $0x8] sm:$0xff] }
   0x2   :  { %18 = vadd.xlane.f32.xlu0 %v14_v0  ;;  %v24_v2 = vmul.f32 %v14_v0, %v14_v0  ;;  %v25_v3 = vmul.f32 %v15_v1, %v15_v1  ;;  %v66_v20 = vld [vmem:[%s111_s1] ss:$0 sm:$0xff] }
   0x3   :  { %v67_v22 = vld [vmem:[%s112_s2] ss:$0 sm:$0xff] }
   0x4   :  { %26 = vadd.xlane.f32.xlu1 %v24_v2 }
   0x6   :  { %20 = vadd.xlane.f32.xlu0 %v15_v1 }
   0x8   :  { %28 = vadd.xlane.f32.xlu1 %v25_v3 }
  0x8f   :  { %v19_v4 = vpop.xlane.xlu0 %18 }
  0x90   :  { %v22_v5 = vmul.f32 0.03125, %v19_v4 }
  0x91   :  { %v27_v6 = vpop.xlane.xlu1 %26 }
  0x92   :  { %v32_v7 = vmul.f32 %v22_v5, %v22_v5  ;;  %v30_v8 = vmul.f32 0.03125, %v27_v6  ;;  %v36_v18 = vsub.f32 %v14_v0, %v22_v5 }
  0x93   :  { %v21_v9 = vpop.xlane.xlu0 %20 }
  0x94   :  { %v34_v10 = vsub.f32 %v30_v8, %v32_v7  ;;  %v23_v11 = vmul.f32 0.03125, %v21_v9 }
  0x95   :  { %v29_v12 = vpop.xlane.xlu1 %28 }
  0x96   :  { %v38_v13 = vadd.f32 1e-05, %v34_v10  ;;  %v33_v14 = vmul.f32 %v23_v11, %v23_v11  ;;  %v31_v15 = vmul.f32 0.03125, %v29_v12  ;;  %v37_v24 = vsub.f32 %v15_v1, %v23_v11 }
  0x98   :  { %68 = vrsqrt.f32 %v38_v13  ;;  %v35_v16 = vsub.f32 %v31_v15, %v33_v14 }
  0x9a   :  { %v39_v17 = vadd.f32 1e-05, %v35_v16 }
  0x9c   :  { %70 = vrsqrt.f32 %v39_v17 }
  0xa2   :  { %v69_v19 = vpop.eup %68 }
  0xa3   :  { %v42_v21 = vmul.f32 %v69_v19, %v36_v18 }
  0xa5   :  { %v50_v23 = vmul.f32 %v66_v20, %v42_v21 }
  0xa6   :  { %v71_v25 = vpop.eup %70 }
  0xa7   :  { %v58_v26 = vadd.f32 %v67_v22, %v50_v23  ;;  %v43_v27 = vmul.f32 %v71_v25, %v37_v24 }
  0xa9   :  { %60 = vst [vmem:[%s113_s3] sm:$0xff] %v58_v26  ;;  %v51_v28 = vmul.f32 %v66_v20, %v43_v27 }
  0xab   :  { %v59_v29 = vadd.f32 %v67_v22, %v51_v28 }
  0xad   :  { %61 = vst [vmem:[%s113_s3 + $0x8] sm:$0xff] %v59_v29 }

// kernel: sentiment_model_forward.7
= control target key start
LH: loop header
LB: loop body
LE: loop exit
PB: predicated region body
PF: predicated region fallthrough
CT: control target
= control target key end

     0   :  { %v311_v1 = vmov 0.0   ;;  %vm312_vm0 = vmmov 0   ;;  %s395_s0 = inlined_call_operand.vmem [shape: f32[2,128], index: 0, kind: input, shape index: {}]   ;;  %s396_s1 = inlined_call_operand.vmem [shape: bf16[128,32], index: 1, kind: input, shape index: {}]   ;;  %s397_s2 = inlined_call_operand.vmem [shape: f32[1,32], index: 2, kind: input, shape index: {}]   ;;  %s398_s3 = inlined_call_operand.vmem [shape: bf16[32,128], index: 3, kind: input, shape index: {}]   ;;  %s399_s4 = inlined_call_operand.vmem [shape: f32[1,128], index: 4, kind: input, shape index: {}]   ;;  %s400_s5 = inlined_call_operand.hbm [shape: f32[2,128], index: 5, kind: output, shape index: {}]  }
   0x1   :  { %v275_v0 = vld [vmem:[%s396_s1] sm:$0xff]   ;;  %244 = vmatprep.subr.bf16.mxu0 %v311_v1  ;;  %264 = vmatprep.subr.bf16.mxu1 %v311_v1  ;;  %v276_v2 = vld [vmem:[%s396_s1 + $0x8] sm:$0xff]   ;;  %v277_v3 = vld [vmem:[%s396_s1 + $0x10] sm:$0xff]  }
   0x2   :  { %245 = vmatpush3.bf16.msra.mxu0 %v275_v0  ;;  %260 = vmatprep.mubr.msk.bf16.mxu0 %vm312_vm0, %v311_v1  ;;  %v278_v4 = vld [vmem:[%s396_s1 + $0x18] sm:$0xff]  }
   0x3   :  { %246 = vmatprep.subr.bf16.mxu0 %v311_v1  ;;  %268 = vmatprep.mubr.msk.bf16.mxu1 %vm312_vm0, %v311_v1 }
   0x6   :  { %247 = vmatpush3.bf16.msra.mxu0 %v276_v2 }
   0x7   :  { %248 = vmatprep.subr.bf16.mxu0 %v311_v1 }
   0xa   :  { %249 = vmatpush3.bf16.msra.mxu0 %v277_v3 }
   0xb   :  { %10 = vsyncpa [#allocation3], 0  ;;  %250 = vmatprep.subr.bf16.mxu0 %v311_v1  ;;  %v279_v5 = vld [vmem:[%s396_s1 + $0x20] sm:$0xff]   ;;  %v280_v6 = vld [vmem:[%s396_s1 + $0x28] sm:$0xff]   ;;  %vm160_vm1 = vcmask 261120  }
   0xc   :  { %v281_v7 = vld [vmem:[%s396_s1 + $0x30] sm:$0xff]   ;;  %v282_v8 = vld [vmem:[%s396_s1 + $0x38] sm:$0xff]   ;;  %v22_v9 = vld [vmem:[%s395_s0] sm:$0x3] }
   0xd   :  { %v23_v10 = vpack.c.bf16 %v22_v9, %v22_v9  ;;  %v283_v11 = vld [vmem:[%s398_s3] sm:$0xff]   ;;  %v284_v12 = vld [vmem:[%s398_s3 + $0x8] sm:$0xff]   ;;  %s313_s3 = smov [#allocation2]  }
   0xe   :  { %251 = vmatpush3.bf16.msra.mxu0 %v278_v4  ;;  %265 = vmatpush3.bf16.msra.mxu1 %v283_v11  ;;  %v219_v13 = vld [vmem:[%s397_s2] ss:$0 sm:$0xff]  ;;  %s211_s17 = sshll.u32 %s313_s3, 4  ;;  %s212_s17 = int_to_ptr.vmem [resolvable:$true] %s211_s17 }
   0xf   :  { %252 = vmatprep.subr.bf16.mxu0 %v311_v1  ;;  %266 = vmatprep.subr.bf16.mxu1 %v311_v1  ;;  %v228_v21 = vld [vmem:[%s399_s4] ss:$0 sm:$0xff]  ;;  %s287_s2 = scalar_lea.vmem %s212_s17, 32  ;;  %p292_p1 = scmp.lt.s32.totalorder %s212_s17, %s212_s17 }
  0x10   :  { %p288_p0 = scmp.ne.s32.totalorder %s212_s17, %s287_s2  ;;  %p293_p2 = scmp.lt.s32.totalorder %s287_s2, %s287_s2 }
  0x12   :  { %253 = vmatpush3.bf16.msra.mxu0 %v279_v5  ;;  %267 = vmatpush3.bf16.msra.mxu1 %v284_v12  ;;  %p294_p3 = por %p293_p2, %p292_p1 }
  0x13   :  { %254 = vmatprep.subr.bf16.mxu0 %v311_v1 }
  0x14   :  { %p295_p4 = pnand %p294_p3, %p288_p0 }
  0x16   :  { %255 = vmatpush3.bf16.msra.mxu0 %v280_v6 }
  0x17   :  { %256 = vmatprep.subr.bf16.mxu0 %v311_v1 }
  0x1a   :  { %257 = vmatpush3.bf16.msra.mxu0 %v281_v7 }
  0x1b   :  { %258 = vmatprep.subr.bf16.mxu0 %v311_v1 }
  0x1e   :  { %259 = vmatpush3.bf16.msra.mxu0 %v282_v8 }
  0x21   :  { %261 = vmatmul.mubr.bf16.vlgmr.msra.gmra.mrb[0].mxu0 %v23_v10 }
  0xf4   :  { %v129_v14 = vpop.f32.mrb[0].mxu0 }
  0xf5   :  { %v130_v15 = vadd.f32 %v219_v13, %v129_v14  ;;  %v262_v16 = vpop.f32.mrb[1].mxu0 }
  0xf6   :  { %v132_v17 = vpop.f32.mrb[2].mxu0 }
  0xf7   :  { %285 = vtanh.f32 %v130_v15  ;;  %v263_v18 = vpop.f32.mrb[3].mxu0 }
 0x101   :  { %v286_v19 = vpop.eup %285 }
 0x102   :  { %v136_v20 = vpack.c.bf16 %v286_v19, %v286_v19 }
 0x104   :  { %269 = vmatmul.mubr.msk.bf16.vlgmr.msra.gmra.mrb[0].mxu1 %vm160_vm1, %v136_v20 }
 0x1d7   :  { %v198_v22 = vpop.f32.mrb[0].mxu1 }
 0x1d8   :  { %v199_v23 = vadd.f32 %v228_v21, %v198_v22  ;;  %v270_v24 = vpop.f32.mrb[1].mxu1 }
 0x1d9   :  { %v201_v25 = vpop.f32.mrb[2].mxu1 }
 0x1da   :  { %204 = vst [vmem:[#allocation2] sm:$0x3] %v199_v23  ;;  %v271_v26 = vpop.f32.mrb[3].mxu1 }
 0x1db   :  { %298 = shalt.err (!%p295_p4)
}
 0x1dc   :  { %s299_s4 = scalar_lea.hbm %s400_s5, 32 }
 0x1dd   :  { %p300_p5 = scmp.ne.s32.totalorder %s400_s5, %s299_s4  ;;  %p303_p6 = scmp.lt.u32.totalorder %s299_s4, %s400_s5 }
 0x1df   :  { %p305_p7 = pnand %p303_p6, %p300_p5 }
 0x1e1   :  { %308 = shalt.err (!%p305_p7)
}
 0x1e2   :  { %214 = dma.vmem_to_hbm [thread:$0]  %s212_s17, 32, %s400_s5, [#allocation3]  }
 0x1e3   :  { %309 = dma.done.wait [#allocation3], 32  }
 0x1e4   :  { %310 = vsyncadd [#allocation3], 4294967264 }
 0x1e5   :  { %218 = vsyncpa [#allocation3], 1 }

// kernel: sentiment_model_forward.5
= control target key start
LH: loop header
LB: loop body
LE: loop exit
PB: predicated region body
PF: predicated region fallthrough
CT: control target
= control target key end

     0   :  { %v1332_v0 = vmov 0.0   ;;  %vm1333_vm0 = vmmov 0   ;;  %vm173_vm1 = vcmask 130048   ;;  %v1335_v25 = vmov 1966171168   ;;  %s1337_s19 = smov 80   ;;  %s1643_s2 = inlined_call_operand.vmem [shape: bf16[128,96], index: 2, kind: input, shape index: {}]   ;;  %s1644_s0 = inlined_call_operand.vmem [shape: f32[16,128], index: 0, kind: input, shape index: {}]   ;;  %s1645_s3 = inlined_call_operand.vmem [shape: f32[1,96], index: 3, kind: input, shape index: {}]   ;;  %s1646_s1 = inlined_call_operand.vmem [shape: f32[2,8], index: 1, kind: input, shape index: {}]   ;;  %s1647_s4 = inlined_call_operand.vmem [shape: bf16[32,128], index: 4, kind: input, shape index: {}]   ;;  %s1648_s5 = inlined_call_operand.vmem [shape: f32[1,128], index: 5, kind: input, shape index: {}]   ;;  %s1649_s8 = inlined_call_operand.vmem [shape: bf16[128,64], index: 8, kind: input, shape index: {}]   ;;  %s1650_s6 = inlined_call_operand.vmem [shape: f32[1,128], index: 6, kind: input, shape index: {}]   ;;  %s1651_s7 = inlined_call_operand.vmem [shape: f32[1,128], index: 7, kind: input, shape index: {}]   ;;  %s1652_s10 = inlined_call_operand.vmem [shape: bf16[64,128], index: 10, kind: input, shape index: {}]   ;;  %s1653_s9 = inlined_call_operand.vmem [shape: f32[1,64], index: 9, kind: input, shape index: {}]   ;;  %s1654_s11 = inlined_call_operand.vmem [shape: f32[1,128], index: 11, kind: input, shape index: {}]   ;;  %s1655_s12 = inlined_call_operand.vmem [shape: f32[1,128], index: 12, kind: input, shape index: {}]   ;;  %s1656_s13 = inlined_call_operand.vmem [shape: f32[1,128], index: 13, kind: input, shape index: {}]   ;;  %s1657_s14 = inlined_call_operand.vmem [shape: f32[16,128], index: 14, kind: output, shape index: {}]  }
   0x1   :  { %1162 = vmatprep.subr.bf16.mxu0 %v1332_v0  ;;  %v1282_v1 = vld [vmem:[%s1643_s2] sm:$0xff]   ;;  %1178 = vmatprep.mubr.msk.bf16.mxu0 %vm1333_vm0, %v1332_v0  ;;  %v1283_v2 = vld [vmem:[%s1643_s2 + $0x8] sm:$0xff]   ;;  %v1284_v3 = vld [vmem:[%s1643_s2 + $0x10] sm:$0xff]   ;;  %v281_v26 = vunpack.c.l.s4 %v1335_v25  ;;  %v283_v27 = vlaneseq  ;;  %vm306_vm2 = vcmask 64512   ;;  %vm336_vm3 = vcmask 1043456   ;;  %s1338_s20 = smov 112  }
   0x2   :  { %1182 = vmatprep.subr.bf16.mxu1 %v1332_v0  ;;  %1184 = vmatprep.mubr.msk.bf16.mxu1 %vm1333_vm0, %v1332_v0  ;;  %v1285_v4 = vld [vmem:[%s1643_s2 + $0x18] sm:$0xff]   ;;  %v1286_v5 = vld [vmem:[%s1643_s2 + $0x20] sm:$0xff]   ;;  %v1287_v6 = vld [vmem:[%s1643_s2 + $0x28] sm:$0xff]   ;;  %s1339_s21 = smov 48   ;;  %vm980_vm4 = vcmask 523264  }
   0x3   :  { %1163 = vmatpush3.bf16.msra.mxu0 %v1282_v1  ;;  %v1288_v7 = vld [vmem:[%s1643_s2 + $0x30] sm:$0xff]   ;;  %v1289_v8 = vld [vmem:[%s1643_s2 + $0x38] sm:$0xff]   ;;  %v1454_v9 = vld [vmem:[%s1644_s0] sm:$0xff]  ;;  %v282_v28 = vunpack.c.0.s8 %v281_v26  ;;  %v284_v29 = vshrl.u32 %v283_v27, 7 }
   0x4   :  { %1164 = vmatprep.subr.bf16.mxu0 %v1332_v0  ;;  %v1459_v10 = vld [vmem:[%s1644_s0 + $0x8] sm:$0xff]  ;;  %v1077_v12 = vld [vmem:[%s1645_s3] ss:$0 sm:$0xff]  ;;  %s1334_s0 = smov 96  }
   0x5   :  { %v50_v11 = vpack.c.bf16 %v1459_v10, %v1454_v9  ;;  %v285_v30 = vsub.s32 %v282_v28, %v284_v29  ;;  %v1088_v31 = vld.sshfl [vmem:[%s1646_s1] sm:$0x11 pattern:$0x75316420]  ;;  %v296_v33 = vsub.s32 0, %v284_v29  ;;  %s1336_s1 = smov 64  }
   0x6   :  { %v279_v34 = vcombine.high %v1088_v31, %v1088_v31 }
   0x7   :  { %1165 = vmatpush3.bf16.msra.mxu0 %v1283_v2  ;;  %v286_v32 = vrot.slane %v1088_v31, %v285_v30 }
   0x8   :  { %1166 = vmatprep.subr.bf16.mxu0 %v1332_v0  ;;  %v293_v42 = vrot.slane %v279_v34, %v285_v30 }
   0x9   :  { %v1491_v35 = vrot.slane %v286_v32, %v296_v33 }
   0xa   :  { %v1495_v44 = vrot.slane %v293_v42, %v296_v33 }
   0xb   :  { %1167 = vmatpush3.bf16.msra.mxu0 %v1284_v3 }
   0xc   :  { %1168 = vmatprep.subr.bf16.mxu0 %v1332_v0 }
   0xf   :  { %1169 = vmatpush3.bf16.msra.mxu0 %v1285_v4 }
  0x10   :  { %1170 = vmatprep.subr.bf16.mxu0 %v1332_v0 }
  0x13   :  { %1171 = vmatpush3.bf16.msra.mxu0 %v1286_v5 }
  0x14   :  { %1172 = vmatprep.subr.bf16.mxu0 %v1332_v0 }
  0x17   :  { %1173 = vmatpush3.bf16.msra.mxu0 %v1287_v6 }
  0x18   :  { %1174 = vmatprep.subr.bf16.mxu0 %v1332_v0 }
  0x1b   :  { %1175 = vmatpush3.bf16.msra.mxu0 %v1288_v7 }
  0x1c   :  { %1176 = vmatprep.subr.bf16.mxu0 %v1332_v0 }
  0x1f   :  { %1177 = vmatpush3.bf16.msra.mxu0 %v1289_v8 }
  0x20   :  { %1218 = vmatprep.subr.bf16.mxu0 %v1332_v0 }
  0x22   :  { %1179 = vmatmul.mubr.bf16.vlgmr.msra.gmra.mrb[0].mxu0 %v50_v11 }
  0x23   :  { %1220 = vmatprep.mubr.msk.bf16.mxu0 %vm1333_vm0, %v1332_v0 }
  0xf5   :  { %v156_v13 = vpop.f32.mrb[0].mxu0 }
  0xf6   :  { %v157_v14 = vadd.f32 %v1077_v12, %v156_v13  ;;  %v1180_v15 = vpop.f32.mrb[1].mxu0 }
  0xf7   :  { %v159_v16 = vpop.f32.mrb[2].mxu0 }
  0xf8   :  { %v1470_v17 = vpack.c.bf16 %v157_v14, %v157_v14  ;;  %v160_v18 = vadd.f32 %v1077_v12, %v159_v16  ;;  %v1181_v19 = vpop.f32.mrb[3].mxu0 }
  0xfa   :  { %171 = vrot.lane.b32.xlu0 %v1470_v17, %s1334_s0  ;;  %v1473_v20 = vpack.c.bf16 %v160_v18, %v160_v18 }
  0xfe   :  { %221 = vrot.lane.b32.xlu0 %v1473_v20, %s1334_s0 }
 0x16c   :  { %v172_v21 = vpop.permute.xlu0 %171 }
 0x16d   :  { %v178_v22 = vsel %vm173_vm1, %v172_v21, 0 }
 0x16e   :  { %1183 = vmatpush3.bf16.xpose.msra.mxu1 %v178_v22 }
 0x16f   :  { %1188 = vmatprep.subr.bf16.mxu1 %v1332_v0 }
 0x170   :  { %v222_v23 = vpop.permute.xlu0 %221 }
 0x171   :  { %v227_v24 = vsel %vm173_vm1, %v222_v23, 0 }
 0x175   :  { %1185 = vmatmul.mubr.msk.bf16.vlgmr.msra.gmra.mrb[0].mxu1 %vm173_vm1, %v1470_v17 }
 0x176   :  { %1189 = vmatpush3.bf16.xpose.msra.mxu1 %v227_v24  ;;  %1190 = vmatprep.mubr.msk.bf16.mxu1 %vm1333_vm0, %v1332_v0 }
 0x177   :  { %1194 = vmatprep.subr.bf16.mxu1 %v1332_v0 }
 0x17d   :  { %1191 = vmatmul.mubr.msk.bf16.vlgmr.msra.gmra.mrb[4].mxu1 %vm173_vm1, %v1473_v20 }
 0x17e   :  { %1196 = vmatprep.mubr.msk.bf16.mxu1 %vm1333_vm0, %v1332_v0 }
 0x248   :  { %v214_v36 = vpop.f32.mrb[0].mxu1 }
 0x249   :  { %v269_v37 = vmul.f32 0.25, %v214_v36  ;;  %v1186_v38 = vpop.f32.mrb[1].mxu1 }
 0x24a   :  { %v217_v39 = vpop.f32.mrb[2].mxu1 }
 0x24b   :  { %v1187_v40 = vpop.f32.mrb[3].mxu1  ;;  %v304_v41 = vadd.f32 %v1491_v35, %v269_v37 }
 0x24d   :  { %v307_v43 = vsel %vm306_vm2, %v304_v41, -inf }
 0x24e   :  { %308 = vmax.xlane.f32.xlu1 %v307_v43 }
 0x250   :  { %v263_v45 = vpop.f32.mrb[4].mxu1 }
 0x251   :  { %v270_v46 = vmul.f32 0.25, %v263_v45  ;;  %v1192_v47 = vpop.f32.mrb[5].mxu1 }
 0x252   :  { %v266_v48 = vpop.f32.mrb[6].mxu1 }
 0x253   :  { %v1193_v49 = vpop.f32.mrb[7].mxu1  ;;  %v305_v50 = vadd.f32 %v1495_v44, %v270_v46 }
 0x255   :  { %v310_v51 = vsel %vm306_vm2, %v305_v50, -inf }
 0x256   :  { %311 = vmax.xlane.f32.xlu1 %v310_v51 }
 0x267   :  { %331 = vrot.lane.b32.xlu1 %v1470_v17, %s1336_s1 }
 0x26b   :  { %380 = vrot.lane.b32.xlu1 %v1473_v20, %s1336_s1 }
 0x2db   :  { %v309_v52 = vpop.xlane.xlu1 %308 }
 0x2dc   :  { %v313_v53 = vsub.f32 %v304_v41, %v309_v52 }
 0x2de   :  { %v315_v54 = vmul.f32 1.442695, %v313_v53 }
 0x2e0   :  { %1304 = vpow2.f32 %v315_v54 }
 0x2e3   :  { %v312_v55 = vpop.xlane.xlu1 %311 }
 0x2e4   :  { %v314_v56 = vsub.f32 %v305_v50, %v312_v55 }
 0x2e6   :  { %v317_v57 = vmul.f32 1.442695, %v314_v56 }
 0x2e7   :  { %v332_v58 = vpop.permute.xlu1 %331 }
 0x2e8   :  { %1306 = vpow2.f32 %v317_v57  ;;  %v338_v59 = vsel %vm336_vm3, %v332_v58, 0 }
 0x2e9   :  { %1195 = vmatpush3.bf16.msra.mxu1 %v338_v59 }
 0x2ea   :  { %v1305_v60 = vpop.eup %1304  ;;  %1200 = vmatprep.subr.bf16.mxu1 %v1332_v0 }
 0x2eb   :  { %v319_v61 = vsel %vm306_vm2, %v1305_v60, 0.0  ;;  %v381_v2 = vpop.permute.xlu1 %380 }
 0x2ec   :  { %320 = vadd.xlane.f32.xlu0 %v319_v61  ;;  %v386_v7 = vsel %vm336_vm3, %v381_v2, 0  ;;  %v1291_v2 = vld [vmem:[%s1647_s4 + $0x8] sm:$0xff]  }
 0x2f2   :  { %v1307_v62 = vpop.eup %1306 }
 0x2f3   :  { %v322_v63 = vsel %vm306_vm2, %v1307_v62, 0.0 }
 0x2f4   :  { %323 = vadd.xlane.f32.xlu1 %v322_v63  ;;  %v1290_v63 = vld [vmem:[%s1647_s4] sm:$0xff]  }
 0x302   :  { %481 = vrot.lane.b32.xlu0 %v1473_v20, %s1337_s19 }
 0x305   :  { %431 = vrot.lane.b32.xlu1 %v1470_v17, %s1337_s19 }
 0x309   :  { %429 = vrot.lane.b32.xlu1 %v1470_v17, %s1338_s20 }
 0x30d   :  { %479 = vrot.lane.b32.xlu1 %v1473_v20, %s1338_s20 }
 0x379   :  { %v321_v1 = vpop.xlane.xlu0 %320 }
 0x37a   :  { %1308 = vrcp.f32 %v321_v1 }
 0x37d   :  { %v482_v15 = vpop.permute.xlu0 %481 }
 0x37e   :  { %v487_v18 = vsel %vm173_vm1, %v482_v15, 0 }
 0x381   :  { %v324_v3 = vpop.xlane.xlu1 %323 }
 0x382   :  { %1310 = vrcp.f32 %v324_v3 }
 0x384   :  { %v1309_v4 = vpop.eup %1308 }
 0x385   :  { %v327_v5 = vmul.f32 %v1309_v4, %v1305_v60  ;;  %v432_v12 = vpop.permute.xlu1 %431 }
 0x386   :  { %v437_v14 = vsel %vm173_vm1, %v432_v12, 0 }
 0x387   :  { %v329_v6 = vpack.c.bf16 %v327_v5, %v327_v5 }
 0x389   :  { %1197 = vmatmul.mubr.msk.bf16.vlgmr.msra.gmra.mrb[8].mxu1 %vm306_vm2, %v329_v6  ;;  %v430_v16 = vpop.permute.xlu1 %429 }
 0x38a   :  { %1201 = vmatpush3.bf16.msra.mxu1 %v386_v7  ;;  %1202 = vmatprep.mubr.msk.bf16.mxu1 %vm1333_vm0, %v1332_v0 }
 0x38b   :  { %1206 = vmatprep.subr.bf16.mxu1 %v1332_v0 }
 0x38c   :  { %v1311_v8 = vpop.eup %1310 }
 0x38d   :  { %v328_v11 = vmul.f32 %v1311_v8, %v1307_v62  ;;  %v480_v19 = vpop.permute.xlu1 %479 }
 0x38f   :  { %v330_v13 = vpack.c.bf16 %v328_v11, %v328_v11 }
 0x391   :  { %1203 = vmatmul.mubr.msk.bf16.vlgmr.msra.gmra.mrb[12].mxu1 %vm306_vm2, %v330_v13 }
 0x392   :  { %1208 = vmatprep.mubr.msk.bf16.mxu1 %vm1333_vm0, %v1332_v0 }
 0x393   :  { %1207 = vmatpush3.bf16.xpose.msra.mxu1 %v437_v14 }
 0x394   :  { %1212 = vmatprep.subr.bf16.mxu1 %v1332_v0 }
 0x39a   :  { %1209 = vmatmul.mubr.msk.bf16.vlgmr.msra.gmra.mrb[16].mxu1 %vm173_vm1, %v430_v16 }
 0x39b   :  { %1213 = vmatpush3.bf16.xpose.msra.mxu1 %v487_v18  ;;  %1214 = vmatprep.mubr.msk.bf16.mxu1 %vm1333_vm0, %v1332_v0 }
 0x39c   :  { %1224 = vmatprep.subr.bf16.mxu1 %v1332_v0 }
 0x3a2   :  { %1215 = vmatmul.mubr.msk.bf16.vlgmr.msra.gmra.mrb[20].mxu1 %vm173_vm1, %v480_v19 }
 0x3a3   :  { %1226 = vmatprep.mubr.msk.bf16.mxu1 %vm1333_vm0, %v1332_v0 }
 0x45c   :  { %v1527_v21 = vpop.f32.mrb[8].mxu1 }
 0x45d   :  { %v1198_v22 = vpop.f32.mrb[9].mxu1 }
 0x45e   :  { %v377_v23 = vpop.f32.mrb[10].mxu1 }
 0x45f   :  { %v1199_v24 = vpop.f32.mrb[11].mxu1 }
 0x464   :  { %v1529_v25 = vpop.f32.mrb[12].mxu1 }
 0x465   :  { %v428_v26 = vpack.c.bf16 %v1529_v25, %v1527_v21  ;;  %v1204_v27 = vpop.f32.mrb[13].mxu1  ;;  %v1099_v21 = vld [vmem:[%s1648_s5] ss:$0 sm:$0xff] }
 0x466   :  { %v425_v28 = vpop.f32.mrb[14].mxu1 }
 0x467   :  { %v1205_v29 = vpop.f32.mrb[15].mxu1 }
 0x46d   :  { %v473_v30 = vpop.f32.mrb[16].mxu1 }
 0x46e   :  { %v529_v31 = vmul.f32 0.25, %v473_v30  ;;  %v1210_v32 = vpop.f32.mrb[17].mxu1 }
 0x46f   :  { %v476_v33 = vpop.f32.mrb[18].mxu1 }
 0x470   :  { %v1211_v34 = vpop.f32.mrb[19].mxu1  ;;  %v531_v36 = vadd.f32 %v529_v31, %v1491_v35  ;;  %v1292_v33 = vld [vmem:[%s1649_s8] sm:$0xff]  }
 0x471   :  { %v1293_v34 = vld [vmem:[%s1649_s8 + $0x8] sm:$0xff]  }
 0x472   :  { %v533_v37 = vsel %vm306_vm2, %v531_v36, -inf }
 0x473   :  { %534 = vmax.xlane.f32.xlu1 %v533_v37  ;;  %v1297_v37 = vld [vmem:[%s1649_s8 + $0x28] sm:$0xff]  }
 0x475   :  { %v523_v38 = vpop.f32.mrb[20].mxu1 }
 0x476   :  { %v530_v39 = vmul.f32 0.25, %v523_v38  ;;  %v1216_v40 = vpop.f32.mrb[21].mxu1  ;;  %v1298_v38 = vld [vmem:[%s1649_s8 + $0x30] sm:$0xff]  }
 0x477   :  { %v526_v41 = vpop.f32.mrb[22].mxu1 }
 0x478   :  { %v1217_v42 = vpop.f32.mrb[23].mxu1  ;;  %v532_v43 = vadd.f32 %v530_v39, %v1495_v44  ;;  %v1299_v39 = vld [vmem:[%s1649_s8 + $0x38] sm:$0xff]  }
 0x47a   :  { %v536_v45 = vsel %vm306_vm2, %v532_v43, -inf }
 0x47b   :  { %537 = vmax.xlane.f32.xlu0 %v536_v45 }
 0x491   :  { %605 = vrot.lane.b32.xlu0 %v1473_v20, %s1339_s21 }
 0x500   :  { %v535_v46 = vpop.xlane.xlu1 %534 }
 0x501   :  { %v539_v47 = vsub.f32 %v531_v36, %v535_v46  ;;  %v1296_v36 = vld [vmem:[%s1649_s8 + $0x20] sm:$0xff]  }
 0x503   :  { %v541_v48 = vmul.f32 1.442695, %v539_v47 }
 0x505   :  { %1312 = vpow2.f32 %v541_v48 }
 0x508   :  { %v538_v35 = vpop.xlane.xlu0 %537 }
 0x509   :  { %v540_v49 = vsub.f32 %v532_v43, %v538_v35 }
 0x50b   :  { %v543_v50 = vmul.f32 1.442695, %v540_v49 }
 0x50c   :  { %v606_v51 = vpop.permute.xlu0 %605 }
 0x50d   :  { %1314 = vpow2.f32 %v543_v50  ;;  %v611_v52 = vsel %vm336_vm3, %v606_v51, 0 }
 0x50e   :  { %1225 = vmatpush3.bf16.msra.mxu1 %v611_v52 }
 0x50f   :  { %v1313_v53 = vpop.eup %1312  ;;  %1236 = vmatprep.subr.bf16.mxu1 %v1332_v0 }
 0x510   :  { %v545_v44 = vsel %vm306_vm2, %v1313_v53, 0.0 }
 0x511   :  { %546 = vadd.xlane.f32.xlu1 %v545_v44 }
 0x517   :  { %v1315_v54 = vpop.eup %1314 }
 0x518   :  { %v548_v20 = vsel %vm306_vm2, %v1315_v54, 0.0 }
 0x519   :  { %549 = vadd.xlane.f32.xlu1 %v548_v20  ;;  %v1100_v20 = vld [vmem:[%s1650_s6] ss:$0 sm:$0xff] }
 0x52a   :  { %557 = vrot.lane.b32.xlu1 %v1470_v17, %s1339_s21 }
 0x59e   :  { %v547_v55 = vpop.xlane.xlu1 %546 }
 0x59f   :  { %1316 = vrcp.f32 %v547_v55 }
 0x5a6   :  { %v550_v56 = vpop.xlane.xlu1 %549 }
 0x5a7   :  { %1318 = vrcp.f32 %v550_v56 }
 0x5a9   :  { %v1317_v57 = vpop.eup %1316 }
 0x5aa   :  { %v553_v58 = vmul.f32 %v1317_v57, %v1313_v53  ;;  %v558_v59 = vpop.permute.xlu1 %557 }
 0x5ab   :  { %v563_v60 = vsel %vm336_vm3, %v558_v59, 0 }
 0x5ac   :  { %1219 = vmatpush3.bf16.msra.mxu0 %v563_v60  ;;  %v555_v61 = vpack.c.bf16 %v553_v58, %v553_v58  ;;  %v1101_v60 = vld [vmem:[%s1651_s7] ss:$0 sm:$0xff] }
 0x5ad   :  { %1230 = vmatprep.subr.bf16.mxu0 %v1332_v0 }
 0x5af   :  { %1221 = vmatmul.mubr.msk.bf16.vlgmr.msra.gmra.mrb[4].mxu0 %vm306_vm2, %v555_v61 }
 0x5b0   :  { %1232 = vmatprep.mubr.msk.bf16.mxu0 %vm1333_vm0, %v1332_v0  ;;  %1231 = vmatpush3.bf16.msra.mxu0 %v1291_v2  ;;  %v1301_v2 = vld [vmem:[%s1652_s10 + $0x8] sm:$0xff]  }
 0x5b1   :  { %v1319_v62 = vpop.eup %1318  ;;  %1242 = vmatprep.subr.bf16.mxu0 %v1332_v0 }
 0x5b2   :  { %v554_v17 = vmul.f32 %v1319_v62, %v1315_v54 }
 0x5b4   :  { %v556_v1 = vpack.c.bf16 %v554_v17, %v554_v17 }
 0x5b6   :  { %1227 = vmatmul.mubr.msk.bf16.vlgmr.msra.gmra.mrb[24].mxu1 %vm306_vm2, %v556_v1  ;;  %v1300_v1 = vld [vmem:[%s1652_s10] sm:$0xff]  }
 0x5b7   :  { %1237 = vmatpush3.bf16.msra.mxu1 %v1290_v63  ;;  %1238 = vmatprep.mubr.msk.bf16.mxu1 %vm1333_vm0, %v1332_v0 }
 0x5b8   :  { %1262 = vmatprep.subr.bf16.mxu1 %v1332_v0 }
 0x5be   :  { %1239 = vmatmul.mubr.msk.bf16.vlgmr.msra.gmra.mrb[28].mxu1 %vm173_vm1, %v428_v26 }
 0x5bf   :  { %1270 = vmatprep.mubr.msk.bf16.mxu1 %vm1333_vm0, %v1332_v0  ;;  %1263 = vmatpush3.bf16.msra.mxu1 %v1300_v1 }
 0x5c0   :  { %1264 = vmatprep.subr.bf16.mxu1 %v1332_v0 }
 0x5c3   :  { %1265 = vmatpush3.bf16.msra.mxu1 %v1301_v2 }
 0x5c4   :  { %1266 = vmatprep.subr.bf16.mxu1 %v1332_v0 }
 0x682   :  { %v599_v3 = vpop.f32.mrb[4].mxu0 }
 0x683   :  { %v1222_v4 = vpop.f32.mrb[5].mxu0 }
 0x684   :  { %v602_v5 = vpop.f32.mrb[6].mxu0  ;;  %v1303_v4 = vld [vmem:[%s1652_s10 + $0x18] sm:$0xff]  }
 0x685   :  { %v1223_v6 = vpop.f32.mrb[7].mxu0  ;;  %v1102_v5 = vld [vmem:[%s1653_s9] ss:$0 sm:$0xff] }
 0x689   :  { %v647_v7 = vpop.f32.mrb[24].mxu1 }
 0x68a   :  { %v653_v8 = vpack.c.bf16 %v647_v7, %v599_v3  ;;  %v1228_v11 = vpop.f32.mrb[25].mxu1  ;;  %v1302_v3 = vld [vmem:[%s1652_s10 + $0x10] sm:$0xff]  }
 0x68b   :  { %v650_v12 = vpop.f32.mrb[26].mxu1  ;;  %1267 = vmatpush3.bf16.msra.mxu1 %v1302_v3 }
 0x68c   :  { %v1229_v13 = vpop.f32.mrb[27].mxu1  ;;  %1233 = vmatmul.mubr.msk.bf16.vlgmr.msra.gmra.mrb[8].mxu0 %vm173_vm1, %v653_v8  ;;  %1268 = vmatprep.subr.bf16.mxu1 %v1332_v0 }
 0x68d   :  { %1258 = vmatprep.mubr.msk.bf16.mxu0 %vm1333_vm0, %v1332_v0  ;;  %1243 = vmatpush3.bf16.msra.mxu0 %v1292_v33 }
 0x68e   :  { %1244 = vmatprep.subr.bf16.mxu0 %v1332_v0 }
 0x68f   :  { %1269 = vmatpush3.bf16.msra.mxu1 %v1303_v4 }
 0x691   :  { %v747_v14 = vpop.f32.mrb[28].mxu1  ;;  %1245 = vmatpush3.bf16.msra.mxu0 %v1293_v34  ;;  %v1111_v34 = vld [vmem:[%s1654_s11] ss:$0 sm:$0xff] }
 0x692   :  { %v1240_v15 = vpop.f32.mrb[29].mxu1  ;;  %1246 = vmatprep.subr.bf16.mxu0 %v1332_v0 }
 0x693   :  { %v750_v16 = vpop.f32.mrb[30].mxu1 }
 0x694   :  { %v1241_v18 = vpop.f32.mrb[31].mxu1 }
 0x75f   :  { %v697_v19 = vpop.f32.mrb[8].mxu0 }
 0x760   :  { %v748_v22 = vadd.f32 %v747_v14, %v697_v19  ;;  %v1234_v23 = vpop.f32.mrb[9].mxu0 }
 0x761   :  { %v700_v24 = vpop.f32.mrb[10].mxu0 }
 0x762   :  { %v761_v25 = vadd.f32 %v1099_v21, %v748_v22  ;;  %v751_v26 = vadd.f32 %v750_v16, %v700_v24  ;;  %v1235_v27 = vpop.f32.mrb[11].mxu0 }
 0x764   :  { %v762_v28 = vadd.f32 %v1099_v21, %v751_v26  ;;  %v763_v29 = vadd.f32 %v761_v25, %v1454_v9  ;;  %v1294_v9 = vld [vmem:[%s1649_s8 + $0x10] sm:$0xff]  }
 0x765   :  { %1247 = vmatpush3.bf16.msra.mxu0 %v1294_v9 }
 0x766   :  { %767 = vadd.xlane.f32.xlu1 %v763_v29  ;;  %v764_v30 = vadd.f32 %v762_v28, %v1459_v10  ;;  %v773_v31 = vmul.f32 %v763_v29, %v763_v29  ;;  %1248 = vmatprep.subr.bf16.mxu0 %v1332_v0  ;;  %v1295_v10 = vld [vmem:[%s1649_s8 + $0x18] sm:$0xff]  }
 0x768   :  { %769 = vadd.xlane.f32.xlu0 %v764_v30  ;;  %v774_v32 = vmul.f32 %v764_v30, %v764_v30 }
 0x769   :  { %1249 = vmatpush3.bf16.msra.mxu0 %v1295_v10 }
 0x76a   :  { %775 = vadd.xlane.f32.xlu1 %v773_v31  ;;  %1250 = vmatprep.subr.bf16.mxu0 %v1332_v0 }
 0x76c   :  { %777 = vadd.xlane.f32.xlu0 %v774_v32 }
 0x76d   :  { %1251 = vmatpush3.bf16.msra.mxu0 %v1296_v36 }
 0x76e   :  { %1252 = vmatprep.subr.bf16.mxu0 %v1332_v0 }
 0x771   :  { %1253 = vmatpush3.bf16.msra.mxu0 %v1297_v37 }
 0x772   :  { %1254 = vmatprep.subr.bf16.mxu0 %v1332_v0 }
 0x775   :  { %1255 = vmatpush3.bf16.msra.mxu0 %v1298_v38 }
 0x776   :  { %1256 = vmatprep.subr.bf16.mxu0 %v1332_v0 }
 0x779   :  { %1257 = vmatpush3.bf16.msra.mxu0 %v1299_v39 }
 0x7f3   :  { %v768_v40 = vpop.xlane.xlu1 %767 }
 0x7f4   :  { %v771_v41 = vmul.f32 0.03125, %v768_v40 }
 0x7f5   :  { %v770_v42 = vpop.xlane.xlu0 %769 }
 0x7f6   :  { %v772_v43 = vmul.f32 0.03125, %v770_v42  ;;  %v781_v46 = vmul.f32 %v771_v41, %v771_v41  ;;  %v785_v44 = vsub.f32 %v763_v29, %v771_v41 }
 0x7f7   :  { %v776_v45 = vpop.xlane.xlu1 %775 }
 0x7f8   :  { %v779_v47 = vmul.f32 0.03125, %v776_v45  ;;  %v782_v35 = vmul.f32 %v772_v43, %v772_v43  ;;  %v786_v55 = vsub.f32 %v764_v30, %v772_v43 }
 0x7f9   :  { %v778_v48 = vpop.xlane.xlu0 %777 }
 0x7fa   :  { %v783_v49 = vsub.f32 %v779_v47, %v781_v46  ;;  %v780_v50 = vmul.f32 0.03125, %v778_v48 }
 0x7fc   :  { %v787_v51 = vadd.f32 1e-05, %v783_v49  ;;  %v784_v52 = vsub.f32 %v780_v50, %v782_v35 }
 0x7fe   :  { %1320 = vrsqrt.f32 %v787_v51  ;;  %v788_v53 = vadd.f32 1e-05, %v784_v52 }
 0x800   :  { %1322 = vrsqrt.f32 %v788_v53 }
 0x808   :  { %v1321_v54 = vpop.eup %1320 }
 0x809   :  { %v791_v56 = vmul.f32 %v1321_v54, %v785_v44 }
 0x80a   :  { %v1323_v57 = vpop.eup %1322 }
 0x80b   :  { %v792_v58 = vmul.f32 %v1323_v57, %v786_v55  ;;  %v799_v59 = vmul.f32 %v1100_v20, %v791_v56 }
 0x80d   :  { %v800_v61 = vmul.f32 %v1100_v20, %v792_v58  ;;  %v807_v62 = vadd.f32 %v1101_v60, %v799_v59  ;;  %v1117_v58 = vld [vmem:[%s1655_s12] ss:$0 sm:$0xff] }
 0x80f   :  { %v808_v17 = vadd.f32 %v1101_v60, %v800_v61 }
 0x811   :  { %v809_v63 = vpack.c.bf16 %v808_v17, %v807_v62 }
 0x813   :  { %1259 = vmatmul.mubr.bf16.vlgmr.msra.gmra.mrb[12].mxu0 %v809_v63 }
 0x8e6   :  { %v915_v6 = vpop.f32.mrb[12].mxu0 }
 0x8e7   :  { %v916_v7 = vadd.f32 %v1102_v5, %v915_v6  ;;  %v1260_v8 = vpop.f32.mrb[13].mxu0 }
 0x8e8   :  { %v918_v11 = vpop.f32.mrb[14].mxu0 }
 0x8e9   :  { %v922_v12 = vmul.f32 %v916_v7, %v916_v7  ;;  %v919_v13 = vadd.f32 %v1102_v5, %v918_v11  ;;  %v1261_v14 = vpop.f32.mrb[15].mxu0 }
 0x8eb   :  { %v924_v15 = vmul.f32 %v922_v12, %v916_v7  ;;  %v923_v16 = vmul.f32 %v919_v13, %v919_v13 }
 0x8ed   :  { %v926_v18 = vmul.f32 0.044715, %v924_v15  ;;  %v925_v0 = vmul.f32 %v923_v16, %v919_v13 }
 0x8ef   :  { %v928_v19 = vadd.f32 %v926_v18, %v916_v7  ;;  %v927_v21 = vmul.f32 0.044715, %v925_v0 }
 0x8f1   :  { %v930_v22 = vmul.f32 0.7978846, %v928_v19  ;;  %v929_v23 = vadd.f32 %v927_v21, %v919_v13 }
 0x8f3   :  { %1324 = vtanh.f32 %v930_v22  ;;  %v931_v24 = vmul.f32 0.7978846, %v929_v23 }
 0x8f5   :  { %1326 = vtanh.f32 %v931_v24 }
 0x8fd   :  { %v1325_v25 = vpop.eup %1324 }
 0x8fe   :  { %v934_v26 = vadd.f32 1.0, %v1325_v25 }
 0x8ff   :  { %v1327_v27 = vpop.eup %1326 }
 0x900   :  { %v936_v28 = vmul.f32 0.5, %v934_v26  ;;  %v935_v29 = vadd.f32 1.0, %v1327_v27 }
 0x902   :  { %v937_v30 = vmul.f32 0.5, %v935_v29  ;;  %v938_v31 = vmul.f32 %v936_v28, %v916_v7 }
 0x904   :  { %v939_v32 = vmul.f32 %v937_v30, %v919_v13 }
 0x906   :  { %v940_v33 = vpack.c.bf16 %v939_v32, %v938_v31 }
 0x908   :  { %1271 = vmatmul.mubr.msk.bf16.vlgmr.msra.gmra.mrb[32].mxu1 %vm980_vm4, %v940_v33 }
 0x9db   :  { %v1018_v9 = vpop.f32.mrb[32].mxu1 }
 0x9dc   :  { %v1019_v10 = vadd.f32 %v1111_v34, %v1018_v9  ;;  %v1272_v36 = vpop.f32.mrb[33].mxu1 }
 0x9dd   :  { %v1021_v37 = vpop.f32.mrb[34].mxu1 }
 0x9de   :  { %v1025_v38 = vadd.f32 %v1019_v10, %v807_v62  ;;  %v1022_v39 = vadd.f32 %v1111_v34, %v1021_v37  ;;  %v1273_v40 = vpop.f32.mrb[35].mxu1  ;;  %v1118_v62 = vld [vmem:[%s1656_s13] ss:$0 sm:$0xff] }
 0x9e0   :  { %v1026_v41 = vadd.f32 %v1022_v39, %v808_v17  ;;  %1029 = vadd.xlane.f32.xlu1 %v1025_v38  ;;  %v1035_v42 = vmul.f32 %v1025_v38, %v1025_v38 }
 0x9e2   :  { %1031 = vadd.xlane.f32.xlu0 %v1026_v41  ;;  %v1036_v43 = vmul.f32 %v1026_v41, %v1026_v41 }
 0x9e4   :  { %1037 = vadd.xlane.f32.xlu1 %v1035_v42 }
 0x9e6   :  { %1039 = vadd.xlane.f32.xlu0 %v1036_v43 }
 0xa6d   :  { %v1030_v45 = vpop.xlane.xlu1 %1029 }
 0xa6e   :  { %v1033_v46 = vmul.f32 0.03125, %v1030_v45 }
 0xa6f   :  { %v1032_v47 = vpop.xlane.xlu0 %1031 }
 0xa70   :  { %v1034_v48 = vmul.f32 0.03125, %v1032_v47  ;;  %v1043_v49 = vmul.f32 %v1033_v46, %v1033_v46  ;;  %v1047_v56 = vsub.f32 %v1025_v38, %v1033_v46 }
 0xa71   :  { %v1038_v35 = vpop.xlane.xlu1 %1037 }
 0xa72   :  { %v1041_v50 = vmul.f32 0.03125, %v1038_v35  ;;  %v1044_v52 = vmul.f32 %v1034_v48, %v1034_v48  ;;  %v1048_v59 = vsub.f32 %v1026_v41, %v1034_v48 }
 0xa73   :  { %v1040_v51 = vpop.xlane.xlu0 %1039 }
 0xa74   :  { %v1045_v53 = vsub.f32 %v1041_v50, %v1043_v49  ;;  %v1042_v44 = vmul.f32 0.03125, %v1040_v51 }
 0xa76   :  { %v1049_v54 = vadd.f32 1e-05, %v1045_v53  ;;  %v1046_v20 = vsub.f32 %v1042_v44, %v1044_v52 }
 0xa78   :  { %1328 = vrsqrt.f32 %v1049_v54  ;;  %v1050_v55 = vadd.f32 1e-05, %v1046_v20 }
 0xa7a   :  { %1330 = vrsqrt.f32 %v1050_v55 }
 0xa82   :  { %v1329_v57 = vpop.eup %1328 }
 0xa83   :  { %v1053_v60 = vmul.f32 %v1329_v57, %v1047_v56 }
 0xa84   :  { %v1331_v61 = vpop.eup %1330 }
 0xa85   :  { %v1061_v17 = vmul.f32 %v1117_v58, %v1053_v60  ;;  %v1054_v63 = vmul.f32 %v1331_v61, %v1048_v59 }
 0xa87   :  { %v1069_v1 = vadd.f32 %v1118_v62, %v1061_v17  ;;  %v1062_v2 = vmul.f32 %v1117_v58, %v1054_v63 }
 0xa89   :  { %1071 = vst [vmem:[%s1657_s14] sm:$0xff] %v1069_v1  ;;  %v1070_v3 = vadd.f32 %v1118_v62, %v1062_v2 }
 0xa8b   :  { %1072 = vst [vmem:[%s1657_s14 + $0x8] sm:$0xff] %v1070_v3 }

</bundles_post_ra>
